<compile_context>
chip_gen: v7x
topology: tpu7x:2x2x1
jax: 0.10.0
libtpu: 0.0.40
codegen_flags: <defaults>
</compile_context>

<pallas_src>
import math

import numpy as np
import jax
import jax.numpy as jnp
from jax.experimental import pallas as pl
from jax.experimental.pallas import tpu as pltpu

# ---------------------------------------------------------------------------
# Model dimensions (consistent with the module's __init__)
# ---------------------------------------------------------------------------
OP_DIM = 8          # op_dim
PRED_DIM = 8        # pred_dim
FEATURE_DIM = 8     # feature_dim
HIDDEN_DIM = 32     # lstm_hidden_dim
HID_DIM = 16        # mlp_hid_dim
BITMAP_DIM = 1000   # fixed in the module (sample_bitmap_embed = nn.Linear(1000, hid))
ATTN_DIM = 64       # weighted_hidden / external_rep width
GATE_W = 4 * HIDDEN_DIM            # 128
GX_WIDTH = GATE_W + ATTN_DIM       # 192 = [gates_x | ext]

VMEM_SPEC = pl.BlockSpec(memory_space=pltpu.MemorySpace.VMEM)


def _bucket(n: int) -> int:
    """Next power of two, minimum 8 (keeps jit/Mosaic retraces bounded, 8-aligned)."""
    return max(8, 1 << (max(int(n), 1) - 1).bit_length())


def _round_up(n: int, m: int) -> int:
    return ((n + m - 1) // m) * m


# ---------------------------------------------------------------------------
# Pallas kernels
# ---------------------------------------------------------------------------
def _linear_kernel(x_ref, w_ref, b_ref, o_ref):
    o_ref[...] = (
        jnp.dot(x_ref[...], w_ref[...], preferred_element_type=jnp.float32) + b_ref[...]
    )


@jax.jit
def predicate_embed(params, x):
    # x: (Ncmp_pad, PRED_DIM) -> (Ncmp_pad, HID_DIM); ONE call for the whole forest.
    n = x.shape[0]
    return pl.pallas_call(
        _linear_kernel,
        out_shape=jax.ShapeDtypeStruct((n, HID_DIM), jnp.float32),
        in_specs=[VMEM_SPEC] * 3,
        out_specs=VMEM_SPEC,
    )(x, params["pred_w"], params["pred_b"])


def _prepass_kernel(op_ref, feat_ref, bm_ref, c1_ref, c2_ref, hc_ref,
                    opw_ref, opb_ref, fw_ref, fb_ref, bmw_ref, bmb_ref,
                    wih_ref, lb_ref, erw_ref,
                    o_ref, x_sc):
    # Node-static prepass for ALL nodes of the forest at once.
    f32 = jnp.float32
    D = HID_DIM
    # Assemble concat(op_emb, feat_emb, cond1, cond2, bitmap_emb*has_cond) in a VMEM
    # scratch (avoids an in-kernel lane concatenate), then fold it with two fused
    # K=80 matmuls instead of 10 K=16 block matmuls.
    x_sc[:, 0 * D:1 * D] = (
        jnp.dot(op_ref[...], opw_ref[...], preferred_element_type=f32) + opb_ref[...])
    x_sc[:, 1 * D:2 * D] = (
        jnp.dot(feat_ref[...], fw_ref[...], preferred_element_type=f32) + fb_ref[...])
    x_sc[:, 2 * D:3 * D] = c1_ref[...]
    x_sc[:, 3 * D:4 * D] = c2_ref[...]
    x_sc[:, 4 * D:5 * D] = (
        jnp.dot(bm_ref[...], bmw_ref[...], preferred_element_type=f32)
        + bmb_ref[...]) * hc_ref[...]
    x = x_sc[...]                                                            # (Np, 80)
    o_ref[:, 0:GATE_W] = (
        jnp.dot(x, wih_ref[...], preferred_element_type=f32) + lb_ref[...])  # gates_x+b
    o_ref[:, GATE_W:GX_WIDTH] = jnp.dot(x, erw_ref[...], preferred_element_type=f32)


@jax.jit
def prepass_forward(params, op, feat, bitmap, cond1, cond2, has_cond):
    n = op.shape[0]
    return pl.pallas_call(
        _prepass_kernel,
        out_shape=jax.ShapeDtypeStruct((n, GX_WIDTH), jnp.float32),
        in_specs=[VMEM_SPEC] * 15,
        out_specs=VMEM_SPEC,
        scratch_shapes=[pltpu.VMEM((n, 5 * HID_DIM), jnp.float32)],
    )(op, feat, bitmap, cond1, cond2, has_cond,
      params["op_w"], params["op_b"], params["feat_w"], params["feat_b"],
      params["bitmap_w"], params["bitmap_b"],
      params["lstm_w_ih"], params["lstm_b"], params["er_w"])


def _level_kernel(gx_ref, desc_ref, cnt_ref, cell_ref,
                  whw_ref, wts_ref, htw_ref, htb_ref, whh_ref,
                  o_ref):
    f32 = jnp.float32
    Bt, Kp, H = desc_ref.shape                  # (tile_rows, Kmax_pad, 32)

    gates_x = gx_ref[:, 0:GATE_W]               # (Bt,128) precomputed x@W_ih + b
    ext = gx_ref[:, GATE_W:GX_WIDTH]            # (Bt,64)  precomputed x@er_w
    desc = desc_ref[...]                        # (Bt,Kp,32) zero-padded descendants
    cnt = cnt_ref[...]                          # (Bt,1)   number of valid descendants
    cell = cell_ref[...]                        # (Bt,32)

    # ---- batched masked descendant attention (flash-style lane softmax over Kp) ----
    pre = jnp.dot(desc.reshape(Bt * Kp, H), whw_ref[...],
                  preferred_element_type=f32).reshape(Bt, Kp, ATTN_DIM)
    th = jnp.tanh(pre + ext[:, None, :])                                     # (Bt,Kp,64)
    w_q = jnp.broadcast_to(wts_ref[...].reshape(1, 1, ATTN_DIM), (Bt, 1, ATTN_DIM))
    scores = jnp.einsum('bqd,bkd->bqk', w_q, th,
                        preferred_element_type=f32)                          # (Bt,1,Kp)
    kidx = jax.lax.broadcasted_iota(f32, (Bt, 1, Kp), 2)
    valid = kidx < cnt[:, None, :]                                           # (Bt,1,Kp)
    masked = jnp.where(valid, scores, jnp.float32(-1e30))
    m = jnp.max(masked, axis=-1, keepdims=True)                              # (Bt,1,1)
    e = jnp.where(valid, jnp.exp(masked - m), 0.0)                           # (Bt,1,Kp)
    tot = jnp.sum(e, axis=-1, keepdims=True)
    attn = e / jnp.where(tot > 0.0, tot, 1.0)                                # (Bt,1,Kp)
    summed = jnp.einsum('bqk,bkd->bqd', attn, desc,
                        preferred_element_type=f32).reshape(Bt, H)           # (Bt,32)
    transformed = jnp.tanh(
        jnp.dot(summed, htw_ref[...], preferred_element_type=f32) + htb_ref[...])
    # count==1: softmax puts weight 1 on the lone valid row, so `summed` IS that
    # descendant (reference bypasses hidden_transformation); count==0: zeros.
    h0 = jnp.where(cnt > 1.5, transformed,
                   jnp.where(cnt > 0.5, summed, jnp.zeros_like(summed)))     # (Bt,32)

    # ---- single-step LSTM cell (PyTorch gate order i, f, g, o) ----
    gates = gates_x + jnp.dot(h0, whh_ref[...], preferred_element_type=f32)  # (Bt,128)
    i_g = jax.nn.sigmoid(gates[:, 0:H])
    f_g = jax.nn.sigmoid(gates[:, H:2 * H])
    g_g = jnp.tanh(gates[:, 2 * H:3 * H])
    o_g = jax.nn.sigmoid(gates[:, 3 * H:4 * H])
    c_new = f_g * cell + i_g * g_g
    o_ref[:, 0:H] = o_g * jnp.tanh(c_new)       # h packed with c in one (Bt,64) block
    o_ref[:, H:2 * H] = c_new


@jax.jit
def level_forward(params, gx_lvl, desc, cnt, cell):
    """One fused pallas_call per tree level over the whole (bucketed) level batch."""
    b_pad, kp, h = desc.shape
    tile_b = min(b_pad, 128)
    grid = (b_pad // tile_b,)

    def _w(shape):
        return pl.BlockSpec(shape, lambda t: (0, 0))

    return pl.pallas_call(
        _level_kernel,
        out_shape=jax.ShapeDtypeStruct((b_pad, 2 * HIDDEN_DIM), jnp.float32),
        grid=grid,
        in_specs=[
            pl.BlockSpec((tile_b, GX_WIDTH), lambda t: (t, 0)),
            pl.BlockSpec((tile_b, kp, h), lambda t: (t, 0, 0)),
            pl.BlockSpec((tile_b, 1), lambda t: (t, 0)),
            pl.BlockSpec((tile_b, HIDDEN_DIM), lambda t: (t, 0)),
            _w(params["wh_w"].shape), _w(params["wts_row"].shape),
            _w(params["ht_w"].shape), _w(params["ht_b"].shape),
            _w(params["lstm_w_hh"].shape),
        ],
        out_specs=pl.BlockSpec((tile_b, 2 * HIDDEN_DIM), lambda t: (t, 0)),
        compiler_params=pltpu.CompilerParams(dimension_semantics=("parallel",)),
    )(gx_lvl, desc, cnt, cell,
      params["wh_w"], params["wts_row"], params["ht_w"], params["ht_b"],
      params["lstm_w_hh"])


def _heads_kernel(x_ref, w1_ref, b1_ref, w2_ref, b2_ref, w3_ref, b3_ref, o_ref):
    f32 = jnp.float32
    h = jnp.maximum(
        jnp.dot(x_ref[...], w1_ref[...], preferred_element_type=f32) + b1_ref[...], 0.0)
    h = jnp.maximum(
        jnp.dot(h, w2_ref[...], preferred_element_type=f32) + b2_ref[...], 0.0)
    o_ref[...] = jax.nn.sigmoid(
        jnp.dot(h, w3_ref[...], preferred_element_type=f32) + b3_ref[...])


@jax.jit
def heads_forward(params, x):
    # Both output heads fused: stacked w1, block-diag w2/w3 -> one (B, 2) output.
    b = x.shape[0]
    out = pl.pallas_call(
        _heads_kernel,
        out_shape=jax.ShapeDtypeStruct((b, 2), jnp.float32),
        in_specs=[VMEM_SPEC] * 7,
        out_specs=VMEM_SPEC,
    )(x, params["head_w1"], params["head_b1"], params["head_w2"], params["head_b2"],
      params["head_w3"], params["head_b3"])
    return out[:, 0:1], out[:, 1:2]


# ---------------------------------------------------------------------------
# Deterministic parameter initialization (PyTorch nn.Linear / nn.LSTM shapes)
# ---------------------------------------------------------------------------
def _linear_params(key, in_dim, out_dim, bias=True):
    k1, k2 = jax.random.split(key)
    bound = 1.0 / math.sqrt(in_dim)
    w = jax.random.uniform(k1, (in_dim, out_dim), jnp.float32, -bound, bound)
    b = jax.random.uniform(k2, (1, out_dim), jnp.float32, -bound, bound) if bias else None
    return w, b


def init_params(key):
    keys = jax.random.split(key, 24)
    p = {}
    p["op_w"], p["op_b"] = _linear_params(keys[0], OP_DIM, HID_DIM)
    p["pred_w"], p["pred_b"] = _linear_params(keys[1], PRED_DIM, HID_DIM)
    p["bitmap_w"], p["bitmap_b"] = _linear_params(keys[2], BITMAP_DIM, HID_DIM)
    p["feat_w"], p["feat_b"] = _linear_params(keys[3], FEATURE_DIM, HID_DIM)

    # main LSTM(5*HID_DIM -> HIDDEN_DIM), single layer, single step
    in_dim = 5 * HID_DIM
    bound = 1.0 / math.sqrt(HIDDEN_DIM)
    p["lstm_w_ih"] = jax.random.uniform(keys[4], (in_dim, 4 * HIDDEN_DIM), jnp.float32, -bound, bound)
    p["lstm_w_hh"] = jax.random.uniform(keys[5], (HIDDEN_DIM, 4 * HIDDEN_DIM), jnp.float32, -bound, bound)
    b_ih = jax.random.uniform(keys[6], (1, 4 * HIDDEN_DIM), jnp.float32, -bound, bound)
    b_hh = jax.random.uniform(keys[7], (1, 4 * HIDDEN_DIM), jnp.float32, -bound, bound)
    p["lstm_b"] = b_ih + b_hh

    p["wh_w"], _ = _linear_params(keys[8], HIDDEN_DIM, ATTN_DIM, bias=False)   # weighted_hidden
    p["er_w"], _ = _linear_params(keys[9], 5 * HID_DIM, ATTN_DIM, bias=False)  # external_rep
    wts_w, _ = _linear_params(keys[10], ATTN_DIM, 1, bias=False)               # weights (64,1)
    p["wts_row"] = wts_w.reshape(1, ATTN_DIM)                                  # used as VPU row
    p["ht_w"], p["ht_b"] = _linear_params(keys[11], HIDDEN_DIM, HIDDEN_DIM)    # hidden_transformation

    # --- the two output heads, fused offline (zero runtime cost) ---
    h2t1_w, h2t1_b = _linear_params(keys[12], HIDDEN_DIM, HID_DIM)
    h2t2_w, h2t2_b = _linear_params(keys[13], HIDDEN_DIM, HID_DIM)
    h3t1_w, h3t1_b = _linear_params(keys[14], HID_DIM, HID_DIM)
    h3t2_w, h3t2_b = _linear_params(keys[15], HID_DIM, HID_DIM)
    o2t1_w, o2t1_b = _linear_params(keys[16], HID_DIM, 1)
    o2t2_w, o2t2_b = _linear_params(keys[17], HID_DIM, 1)
    p["head_w1"] = jnp.concatenate([h2t1_w, h2t2_w], axis=1)                   # (32, 32)
    p["head_b1"] = jnp.concatenate([h2t1_b, h2t2_b], axis=1)                   # (1, 32)
    w2 = jnp.zeros((2 * HID_DIM, 2 * HID_DIM), jnp.float32)
    w2 = w2.at[:HID_DIM, :HID_DIM].set(h3t1_w).at[HID_DIM:, HID_DIM:].set(h3t2_w)
    p["head_w2"] = w2                                                          # (32, 32) block-diag
    p["head_b2"] = jnp.concatenate([h3t1_b, h3t2_b], axis=1)                   # (1, 32)
    w3 = jnp.zeros((2 * HID_DIM, 2), jnp.float32)
    w3 = w3.at[:HID_DIM, 0:1].set(o2t1_w).at[HID_DIM:, 1:2].set(o2t2_w)
    p["head_w3"] = w3                                                          # (32, 2) block-diag
    p["head_b3"] = jnp.concatenate([o2t1_b, o2t2_b], axis=1)                   # (1, 2)
    # TODO(synk): lstm_embed (nn.LSTM(pred_dim, hidden)) is unused in the 'tree_pool' batch path.
    return p


# ---------------------------------------------------------------------------
# Tree node / condition structures (host-side numpy, like the PyTorch node objects)
# ---------------------------------------------------------------------------
class Condition:
    def __init__(self, op_type, operator=None, vec=None, children=None):
        self.op_type = op_type        # 'Bool' or 'Compare'
        self.operator = operator      # 'AND' or 'OR' (for Bool)
        self.vec = vec                # np (1, PRED_DIM) for Compare
        self.children = children or []


class Node:
    def __init__(self, op_vec, bitmap_vec, feat_vec, has_cond, cond1, cond2, children):
        self.op_vec = op_vec                # np (1, OP_DIM)
        self.bitmap_vec = bitmap_vec        # np (1, 1000)
        self.feat_vec = feat_vec            # np (1, FEATURE_DIM)
        self.has_cond = float(has_cond)
        self.condition1_root = cond1
        self.condition2_root = cond2
        self.children = children
        self._idx = -1


def _collect_compares(cond, acc):
    if cond.op_type == "Compare":
        acc.append(cond)
    else:
        for ch in cond.children:
            _collect_compares(ch, acc)


def _compose_np(cond, emb_lookup):
    # min/max pooling over the (already embedded) Compare leaves, same order as reference
    if cond.op_type == "Compare":
        return emb_lookup[id(cond)]
    result = None
    for ch in cond.children:
        v = _compose_np(ch, emb_lookup)
        if result is None:
            result = v
        else:
            result = np.minimum(result, v) if cond.operator == "AND" else np.maximum(result, v)
    return result


def _index_forest(roots):
    all_nodes = []

    def visit(node):
        node._idx = len(all_nodes)
        all_nodes.append(node)
        for ch in node.children:
            visit(ch)

    for r in roots:
        visit(r)
    return all_nodes


def _count_padded(nodes):
    if not nodes:
        return 0
    total = _bucket(len(nodes))
    left = [n.children[0] for n in nodes if len(n.children) >= 1]
    right = [n.children[1] for n in nodes if len(n.children) >= 2]
    return total + _count_padded(left) + _count_padded(right)


# ---------------------------------------------------------------------------
# Forest-level prepass: predicate embed (once) + node-static gates_x / ext (once)
# ---------------------------------------------------------------------------
def precompute_node_inputs(params, all_nodes):
    compares = []
    for node in all_nodes:
        for root in (node.condition1_root, node.condition2_root):
            if root is not None:
                _collect_compares(root, compares)

    emb_lookup = {}
    if compares:
        n_cmp = len(compares)
        n_pad = _round_up(n_cmp, 8)
        vec = np.zeros((n_pad, PRED_DIM), np.float32)
        for i, c in enumerate(compares):
            vec[i] = np.asarray(c.vec, np.float32).reshape(PRED_DIM)
        emb = np.asarray(predicate_embed(params, jnp.asarray(vec)))[:n_cmp]
        emb_lookup = {id(c): emb[i] for i, c in enumerate(compares)}

    n = len(all_nodes)
    n_pad = _round_up(n, 8)
    op = np.zeros((n_pad, OP_DIM), np.float32)
    feat = np.zeros((n_pad, FEATURE_DIM), np.float32)
    bitmap = np.zeros((n_pad, BITMAP_DIM), np.float32)
    cond1 = np.zeros((n_pad, HID_DIM), np.float32)
    cond2 = np.zeros((n_pad, HID_DIM), np.float32)
    has_cond = np.zeros((n_pad, 1), np.float32)
    for i, node in enumerate(all_nodes):
        op[i] = np.asarray(node.op_vec, np.float32).reshape(OP_DIM)
        feat[i] = np.asarray(node.feat_vec, np.float32).reshape(FEATURE_DIM)
        bitmap[i] = np.asarray(node.bitmap_vec, np.float32).reshape(BITMAP_DIM)
        has_cond[i, 0] = node.has_cond
        if node.condition1_root is not None:
            cond1[i] = _compose_np(node.condition1_root, emb_lookup)
        if node.condition2_root is not None:
            cond2[i] = _compose_np(node.condition2_root, emb_lookup)

    return prepass_forward(params, jnp.asarray(op), jnp.asarray(feat), jnp.asarray(bitmap),
                           jnp.asarray(cond1), jnp.asarray(cond2), jnp.asarray(has_cond))


# ---------------------------------------------------------------------------
# tree_representation / forward (host glue; numeric work in the fused kernels)
# ---------------------------------------------------------------------------
def tree_representation(params, nodes, gx_ext, state):
    batch_size = len(nodes)
    b_pad = _bucket(batch_size)
    h_dim = HIDDEN_DIM

    left_nodes, right_nodes, left_pos, right_pos = [], [], [], []
    desc_idx_lists = [[] for _ in range(batch_size)]
    for i, node in enumerate(nodes):
        if len(node.children) >= 1:
            left_nodes.append(node.children[0])
            left_pos.append(i)
        if len(node.children) >= 2:
            right_nodes.append(node.children[1])
            right_pos.append(i)

    left_cell = jnp.zeros((b_pad, h_dim), jnp.float32)
    right_cell = jnp.zeros((b_pad, h_dim), jnp.float32)

    if left_nodes:
        _, lc, l_desc = tree_representation(params, left_nodes, gx_ext, state)
        for j, i in enumerate(left_pos):
            desc_idx_lists[i].extend(l_desc[j])
        left_cell = left_cell.at[jnp.asarray(left_pos, jnp.int32)].set(lc[: len(left_nodes)])
    if right_nodes:
        _, rc, r_desc = tree_representation(params, right_nodes, gx_ext, state)
        for j, i in enumerate(right_pos):
            desc_idx_lists[i].extend(r_desc[j])
        right_cell = right_cell.at[jnp.asarray(right_pos, jnp.int32)].set(rc[: len(right_nodes)])

    # reference semantics: averaged even with 0/1 children (missing side is zeros)
    cell_state = (left_cell + right_cell) * 0.5                      # (b_pad, 32)

    # --- numpy host padding: descendant index matrix + counts (one transfer each) ---
    kmax = max((len(d) for d in desc_idx_lists), default=0)
    kp = _bucket(max(kmax, 1))
    desc_idx = np.zeros((b_pad, kp), np.int32)            # 0 -> zero sentinel table row
    count = np.zeros((b_pad, 1), np.float32)
    node_idx = np.zeros((b_pad,), np.int32)
    for i, node in enumerate(nodes):
        node_idx[i] = node._idx
        lst = desc_idx_lists[i]
        count[i, 0] = float(len(lst))
        if lst:
            desc_idx[i, : len(lst)] = lst

    gx_lvl = gx_ext[jnp.asarray(node_idx)]                # (b_pad, 192) gather
    desc = state["table"][jnp.asarray(desc_idx)]          # (b_pad, kp, 32) gather
    cnt = jnp.asarray(count)

    # --- single fused per-level kernel: attention + LSTM cell for the whole batch ---
    out = level_forward(params, gx_lvl, desc, cnt, cell_state)       # (b_pad, 64)
    h_new = out[:, :h_dim]
    c_new = out[:, h_dim:]

    base = state["size"]
    state["table"] = state["table"].at[base:base + b_pad].set(h_new)
    state["size"] = base + b_pad
    for i in range(batch_size):
        desc_idx_lists[i].append(base + i)

    return h_new, c_new, desc_idx_lists


def forward(params, roots):
    all_nodes = _index_forest(roots)
    gx_ext = precompute_node_inputs(params, all_nodes)
    capacity = 1 + _count_padded(roots)
    state = {"table": jnp.zeros((capacity, HIDDEN_DIM), jnp.float32), "size": 1}
    h, _, _ = tree_representation(params, roots, gx_ext, state)
    hidden = h[: len(roots)]
    cost, card = heads_forward(params, hidden)
    return cost, card


# ---------------------------------------------------------------------------
# Example: batch of 2 root nodes, each with 2 leaf children
# ---------------------------------------------------------------------------
def make_node(key, children, cond1, cond2, has_cond):
    k1, k2, k3 = jax.random.split(key, 3)
    op_vec = np.asarray(jax.random.normal(k1, (1, OP_DIM), jnp.float32))
    bitmap = np.asarray((jax.random.uniform(k2, (1, BITMAP_DIM)) > 0.5).astype(jnp.float32))
    feat = np.asarray(jax.random.normal(k3, (1, FEATURE_DIM), jnp.float32))
    return Node(op_vec, bitmap, feat, has_cond, cond1, cond2, children)


def make_compare(key):
    return Condition("Compare", vec=np.asarray(jax.random.normal(key, (1, PRED_DIM), jnp.float32)))


if __name__ == "__main__":
    master = jax.random.PRNGKey(0)
    k_params, k_tree = jax.random.split(master)
    params = init_params(k_params)

    ks = jax.random.split(k_tree, 12)
    # leaves (no children, no conditions)
    leaf00 = make_node(ks[0], [], None, None, 0.0)
    leaf01 = make_node(ks[1], [], None, None, 0.0)
    leaf10 = make_node(ks[2], [], None, None, 0.0)
    leaf11 = make_node(ks[3], [], None, None, 1.0)
    # roots with conditions (Compare + Bool of two Compares), 2 children each
    root0_c1 = make_compare(ks[4])
    root0_c2 = Condition("Bool", operator="AND",
                         children=[make_compare(ks[5]), make_compare(ks[6])])
    root1_c1 = make_compare(ks[7])
    root1_c2 = Condition("Bool", operator="OR",
                         children=[make_compare(ks[8]), make_compare(ks[9])])
    root0 = make_node(ks[10], [leaf00, leaf01], root0_c1, root0_c2, 1.0)
    root1 = make_node(ks[11], [leaf10, leaf11], root1_c1, root1_c2, 1.0)

    nodes = [root0, root1]
    cost, card = forward(params, nodes)
    cost = jax.block_until_ready(cost)
    card = jax.block_until_ready(card)

    assert cost.shape == (2, 1) and card.shape == (2, 1)
    assert bool(jnp.all(jnp.isfinite(cost))) and bool(jnp.all(jnp.isfinite(card)))
    assert bool(jnp.all((cost >= 0) & (cost <= 1))) and bool(jnp.all((card >= 0) & (card <= 1)))
    print("KERNEL_OK")
</pallas_src>

<mosaic_0001>
module attributes {stable_mosaic.version = 11 : i64} {
  func.func @_linear_kernel(%arg0: memref<8x8xf32, #tpu.memory_space<vmem>>, %arg1: memref<8x16xf32, #tpu.memory_space<vmem>>, %arg2: memref<1x16xf32, #tpu.memory_space<vmem>>, %arg3: memref<8x16xf32, #tpu.memory_space<vmem>>) attributes {dimension_semantics = [], scalar_prefetch = 0 : i64, scratch_operands = 0 : i64, tpu.core_type = #tpu.core_type<tc>} {
    %c0 = arith.constant 0 : index
    %c0_0 = arith.constant 0 : index
    %0 = vector.load %arg0[%c0, %c0_0] : memref<8x8xf32, #tpu.memory_space<vmem>>, vector<8x8xf32>
    %c0_1 = arith.constant 0 : index
    %c0_2 = arith.constant 0 : index
    %1 = vector.load %arg1[%c0_1, %c0_2] : memref<8x16xf32, #tpu.memory_space<vmem>>, vector<8x16xf32>
    %cst = arith.constant dense<0.000000e+00> : vector<8x16xf32>
    %2 = tpu.matmul %0, %1, %cst {dimension_numbers = #tpu.dot_dimension_numbers<[1], [0], [0], [1], [0, 0, 1, 1], [], []>} : vector<8x8xf32>, vector<8x16xf32>, vector<8x16xf32> -> vector<8x16xf32>
    %c0_3 = arith.constant 0 : index
    %c0_4 = arith.constant 0 : index
    %3 = vector.load %arg2[%c0_3, %c0_4] : memref<1x16xf32, #tpu.memory_space<vmem>>, vector<1x16xf32>
    %4 = vector.broadcast %3 : vector<1x16xf32> to vector<8x16xf32>
    %5 = arith.addf %2, %4 : vector<8x16xf32>
    %c0_5 = arith.constant 0 : index
    %c0_6 = arith.constant 0 : index
    %6 = vector.load %arg3[%c0_5, %c0_6] : memref<8x16xf32, #tpu.memory_space<vmem>>, vector<8x16xf32>
    tpu.vector_store %arg3[%c0_5, %c0_6], %5 {strides = array<i32>} : memref<8x16xf32, #tpu.memory_space<vmem>>, vector<8x16xf32>,
    return
  }
}

</mosaic_0001>

<bundles_post_ra>
// kernel: predicate_embed.1
= control target key start
LH: loop header
LB: loop body
LE: loop exit
PB: predicated region body
PF: predicated region fallthrough
CT: control target
= control target key end

     0   :  { %8 = vsyncpa [#allocation3], 0  ;;  %s334_s0 = inlined_call_operand.hbm [shape: f32[8,8], index: 0, kind: input, shape index: {}]   ;;  %s335_s1 = inlined_call_operand.hbm [shape: f32[8,16], index: 1, kind: input, shape index: {}]   ;;  %s336_s2 = inlined_call_operand.hbm [shape: f32[1,16], index: 2, kind: input, shape index: {}]   ;;  %s337_s3 = inlined_call_operand.hbm [shape: f32[8,16], index: 3, kind: output, shape index: {}]  }
   0x1   :  { %9 = vsyncpa [#allocation6], 0 }
   0x2   :  { %10 = vsyncpa [#allocation4], 0  ;;  %s260_s12 = smov [#allocation5]   ;;  %s261_s14 = smov [#allocation2]  }
   0x3   :  { %s27_s13 = sshll.u32 %s260_s12, 4  ;;  %s17_s15 = sshll.u32 %s261_s14, 4  ;;  %s28_s13 = int_to_ptr.vmem [resolvable:$true] %s27_s13  ;;  %s18_s15 = int_to_ptr.vmem [resolvable:$true] %s17_s15 }
   0x4   :  { %s166_s18 = scalar_lea.hbm %s335_s1, 128 }
   0x5   :  { %p167_p0 = scmp.ne.s32.totalorder %s335_s1, %s166_s18  ;;  %p170_p1 = scmp.lt.u32.totalorder %s166_s18, %s335_s1 }
   0x7   :  { %p172_p2 = pnand %p170_p1, %p167_p0 }
   0x9   :  { %175 = shalt.err (!%p172_p2)
}
   0xa   :  { %s176_s23 = scalar_lea.vmem %s28_s13, 128  ;;  %p181_p4 = scmp.lt.s32.totalorder %s28_s13, %s28_s13 }
   0xb   :  { %p177_p3 = scmp.ne.s32.totalorder %s28_s13, %s176_s23  ;;  %p182_p5 = scmp.lt.s32.totalorder %s176_s23, %s176_s23 }
   0xd   :  { %p183_p6 = por %p182_p5, %p181_p4 }
   0xf   :  { %p184_p7 = pnand %p183_p6, %p177_p3 }
  0x11   :  { %187 = shalt.err (!%p184_p7)
}
  0x12   :  { %30 = dma.hbm_to_vmem [thread:$0]  %s335_s1, 128, %s28_s13, [#allocation6]  }
  0x13   :  { %s188_s28 = scalar_lea.hbm %s334_s0, 128 }
  0x14   :  { %p189_p8 = scmp.ne.s32.totalorder %s334_s0, %s188_s28  ;;  %p192_p9 = scmp.lt.u32.totalorder %s188_s28, %s334_s0 }
  0x16   :  { %p194_p10 = pnand %p192_p9, %p189_p8 }
  0x18   :  { %197 = shalt.err (!%p194_p10)
}
  0x19   :  { %s198_s6 = scalar_lea.vmem %s18_s15, 128  ;;  %p203_p12 = scmp.lt.s32.totalorder %s18_s15, %s18_s15 }
  0x1a   :  { %p199_p11 = scmp.ne.s32.totalorder %s18_s15, %s198_s6  ;;  %p204_p13 = scmp.lt.s32.totalorder %s198_s6, %s198_s6 }
  0x1c   :  { %p205_p0 = por %p204_p13, %p203_p12 }
  0x1e   :  { %p206_p1 = pnand %p205_p0, %p199_p11 }
  0x20   :  { %209 = shalt.err (!%p206_p1)
}
  0x21   :  { %20 = dma.hbm_to_vmem [thread:$0]  %s334_s0, 128, %s18_s15, [#allocation3]  }
  0x22   :  { %s262_s8 = smov [#allocation7]   ;;  %s210_s12 = scalar_lea.hbm %s336_s2, 16 }
  0x23   :  { %s37_s9 = sshll.u32 %s262_s8, 4  ;;  %p211_p2 = scmp.ne.s32.totalorder %s336_s2, %s210_s12  ;;  %s38_s9 = int_to_ptr.vmem [resolvable:$true] %s37_s9 }
  0x24   :  { %p214_p3 = scmp.lt.u32.totalorder %s210_s12, %s336_s2 }
  0x26   :  { %p216_p4 = pnand %p214_p3, %p211_p2 }
  0x28   :  { %219 = shalt.err (!%p216_p4)
}
  0x29   :  { %s220_s18 = scalar_lea.vmem %s38_s9, 16  ;;  %s224_s0 = scalar_lea.vmem %s38_s9, 32 }
  0x2a   :  { %p221_p5 = scmp.ne.s32.totalorder %s38_s9, %s220_s18  ;;  %p225_p6 = scmp.lt.s32.totalorder %s38_s9, %s38_s9 }
  0x2b   :  { %p226_p7 = scmp.lt.s32.totalorder %s224_s0, %s220_s18 }
  0x2d   :  { %p227_p8 = por %p226_p7, %p225_p6 }
  0x2f   :  { %p228_p9 = pnand %p227_p8, %p221_p5 }
  0x31   :  { %231 = shalt.err (!%p228_p9)
}
  0x32   :  { %40 = dma.hbm_to_vmem [thread:$0]  %s336_s2, 16, %s38_s9, [#allocation6]  }
  0x33   :  { %254 = dma.done.wait [#allocation3], 128  }
  0x34   :  { %255 = vsyncadd [#allocation3], 4294967168 }
  0x35   :  { %256 = dma.done.wait [#allocation6], 144  }
  0x36   :  { %257 = vsyncadd [#allocation6], 4294967152  ;;  %v263_v0 = vmov 0.0   ;;  %vm264_vm0 = vmmov 0   ;;  %vm59_vm1 = vcmask 64512   ;;  %v51_v1 = vld [vmem:[#allocation5] sm:$0xff] }
  0x37   :  { %155 = vmatprep.subr.mxu0 %v263_v0  ;;  %157 = vmatprep.mubr.msk.f32.mxu0 %vm264_vm0, %v263_v0  ;;  %v50_v2 = vld [vmem:[#allocation2] sm:$0xff]  ;;  %v151_v3 = vld [vmem:[#allocation7] ss:$0 sm:$0xff]  ;;  %s265_s20 = smov [#allocation8]   ;;  %vm133_vm2 = vcmask 130048  }
  0x38   :  { %156 = vmatpush3.msra.mxu0 %v51_v1  ;;  %s141_s21 = sshll.u32 %s265_s20, 4  ;;  %s142_s21 = int_to_ptr.vmem [resolvable:$true] %s141_s21 }
  0x39   :  { %158 = vmatmul.mubr.msk.f32.vlgmr.msra.gmra.mrb[0].mxu0 %vm59_vm1, %v50_v2  ;;  %s232_s2 = scalar_lea.vmem %s142_s21, 128  ;;  %p237_p11 = scmp.lt.s32.totalorder %s142_s21, %s142_s21 }
  0x3a   :  { %p233_p10 = scmp.ne.s32.totalorder %s142_s21, %s232_s2  ;;  %p238_p12 = scmp.lt.s32.totalorder %s232_s2, %s232_s2 }
  0x3c   :  { %p239_p13 = por %p238_p12, %p237_p11 }
  0x3e   :  { %p240_p0 = pnand %p239_p13, %p233_p10 }
 0x10c   :  { %v129_v4 = vpop.f32.mrb[0].mxu0 }
 0x10d   :  { %v130_v5 = vadd.f32 %v151_v3, %v129_v4  ;;  %v159_v6 = vpop.f32.mrb[1].mxu0 }
 0x10f   :  { %134 = vst.msk [vmem:[#allocation8] sm:$0xff] %vm133_vm2, %v130_v5 }
 0x110   :  { %243 = shalt.err (!%p240_p0)
}
 0x111   :  { %s244_s24 = scalar_lea.hbm %s337_s3, 128 }
 0x112   :  { %p245_p1 = scmp.ne.s32.totalorder %s337_s3, %s244_s24  ;;  %p248_p2 = scmp.lt.u32.totalorder %s244_s24, %s337_s3 }
 0x114   :  { %p250_p3 = pnand %p248_p2, %p245_p1 }
 0x116   :  { %253 = shalt.err (!%p250_p3)
}
 0x117   :  { %144 = dma.vmem_to_hbm [thread:$0]  %s142_s21, 128, %s337_s3, [#allocation4]  }
 0x118   :  { %258 = dma.done.wait [#allocation4], 128  }
 0x119   :  { %259 = vsyncadd [#allocation4], 4294967168 }
 0x11a   :  { %148 = vsyncpa [#allocation3], 1 }
 0x11b   :  { %149 = vsyncpa [#allocation6], 1 }
 0x11c   :  { %150 = vsyncpa [#allocation4], 1 }

</bundles_post_ra>
